<compile_context>
chip_gen: v6e
topology: v6e:2x2x1
jax: 0.10.0
libtpu: 0.0.40
codegen_flags: <defaults>
</compile_context>

<pallas_src>
import jax
import jax.numpy as jnp
from jax.experimental import pallas as pl
from jax.experimental.pallas import tpu as pltpu

_LANE = 128
_SUBLANE = 8


def _denormalize(p, lo, hi):
    # nablafx denormalize_parameters: controller params are normalized to [0, 1].
    return p * (hi - lo) + lo


def _phase_shift_kernel(x_ref, side_ref, o_ref):
    x = x_ref[...].astype(jnp.float32)          # (bt, st)

    side = side_ref[0]                          # (bt, 3): [cos, sin, prev*sin]
    cos_s = side[:, 0:1]
    sin_s = side[:, 1:2]
    prev_sin = side[:, 2:3]

    # rolled[:, k] = x[:, (k-1) mod st] -- correct for lanes 1..st-1; lane 0 is
    # fixed below with the precomputed boundary value (previous tile's last
    # sample, or x[:, seq_len-1] for the first tile).
    rolled = pltpu.roll(x, shift=1, axis=1)
    o_ref[...] = (x * cos_s + rolled * sin_s).astype(o_ref.dtype)

    # Single-column fix-up (masked 1-lane store) instead of a full-tile select.
    o_ref[:, 0:1] = (x[:, 0:1] * cos_s + prev_sin).astype(o_ref.dtype)


def _pick_tiles(bs, seq_len, seq_tile=None, target_block_bytes=8 * 1024 * 1024):
    """Choose (batch_tile, seq_tile) giving ~MiB-scale VMEM blocks."""
    bt = bs if bs <= _SUBLANE else _SUBLANE
    if seq_tile is not None:
        assert seq_tile == seq_len or seq_tile % _LANE == 0
        return bt, min(seq_tile, seq_len)
    # VMEM tile rows are padded to a multiple of 8 sublanes; budget on that.
    rows_padded = ((bt + _SUBLANE - 1) // _SUBLANE) * _SUBLANE
    lanes_budget = max(_LANE,
                       (target_block_bytes // (rows_padded * 4)) // _LANE * _LANE)
    if seq_len <= lanes_budget:
        return bt, seq_len          # single seq block (full-dim block is legal)
    return bt, lanes_budget         # multiple of 128; grid uses cdiv


def phase_shift(x: jax.Array,
                control_params: jax.Array,
                *,
                sample_rate: float = 44100.0,
                min_shift: float = -180.0,
                max_shift: float = +180.0,
                control_type: str = "static",
                train: bool = False,
                seq_tile: int | None = None):
    """Pallas equivalent of PhaseShift.forward.

    x:              (bs, 1, seq_len)
    control_params: (bs, 1, 1)   (static / static-cond control)
    Returns (output, param_dict) like the PyTorch module.
    """
    assert control_type in ("static", "static-cond", "dynamic", "dynamic-cond")
    bs, chs, seq_len = x.shape
    bs_c, chs_c, seq_c = control_params.shape
    assert bs == bs_c
    assert chs == 1
    assert chs_c == 1
    if control_type in ("dynamic", "dynamic-cond") or seq_c != 1:
        # TODO(synk): dynamic (per-sample) shift not implemented; the reference
        # torch process() repeats shift to seq_len**2 which is shape-inconsistent.
        raise NotImplementedError("PhaseShift Pallas kernel supports static control only")

    # --- param dict (get_param_dict + denormalize_parameters) ---------------
    shift = _denormalize(control_params[:, 0, :].astype(jnp.float32),
                         min_shift, max_shift)                     # (bs, 1) deg
    param_dict = {"shift": shift}

    # Per-batch cos/sin of the static phase shift (tiny wrapper-side compute).
    shift_rad = shift * (jnp.pi / 180.0)                           # (bs, 1)
    cos_s = jnp.cos(shift_rad).astype(jnp.float32)                 # (bs, 1)
    sin_s = jnp.sin(shift_rad).astype(jnp.float32)                 # (bs, 1)

    # --- layout plumbing -----------------------------------------------------
    x2d = x.reshape(bs, seq_len)                                   # seq -> lanes

    bt, st = _pick_tiles(bs, seq_len, seq_tile=seq_tile)
    nb = pl.cdiv(bs, bt)
    ns = pl.cdiv(seq_len, st)

    # Boundary samples for the roll: prev[b, j] = x[b, (j*st - 1) mod seq_len].
    # j == 0 gets x[b, seq_len-1] (the full-sequence wrap).  Precomputing this
    # makes every grid point independent (both axes "parallel" for megacore).
    prev_idx = (jnp.arange(ns) * st - 1) % seq_len                 # (ns,)
    prev = x2d[:, prev_idx].astype(jnp.float32)                    # (bs, ns)

    # Merged side input: (ns, bs, 3) = [cos, sin, prev * sin] per (tile, batch).
    side = jnp.stack([jnp.broadcast_to(cos_s, (bs, ns)),
                      jnp.broadcast_to(sin_s, (bs, ns)),
                      prev * sin_s], axis=-1)                      # (bs, ns, 3)
    side = jnp.transpose(side, (1, 0, 2))                          # (ns, bs, 3)

    y2d = pl.pallas_call(
        _phase_shift_kernel,
        out_shape=jax.ShapeDtypeStruct((bs, seq_len), x.dtype),
        grid=(nb, ns),
        in_specs=[
            pl.BlockSpec((bt, st), lambda i, j: (i, j)),       # x tile
            pl.BlockSpec((1, bt, 3), lambda i, j: (j, i, 0)),  # cos/sin/prev*sin
        ],
        out_specs=pl.BlockSpec((bt, st), lambda i, j: (i, j)),
        compiler_params=pltpu.CompilerParams(
            dimension_semantics=("parallel", "parallel"),
            vmem_limit_bytes=48 * 1024 * 1024,
        ),
    )(x2d, side)

    return y2d.reshape(bs, chs, seq_len), param_dict


def _reference(x, ctrl, min_shift=-180.0, max_shift=180.0):
    shift = _denormalize(ctrl[:, 0, :], min_shift, max_shift)       # (bs, 1)
    rad = (shift * (jnp.pi / 180.0)).reshape(x.shape[0], 1, 1)
    return x * jnp.cos(rad) + jnp.roll(x, 1, axis=-1) * jnp.sin(rad), shift


if __name__ == "__main__":
    key = jax.random.PRNGKey(0)
    k1, k2, k3, k4 = jax.random.split(key, 4)

    # Case 1: small static case, single block path.
    bs, chs, seq_len = 2, 1, 256
    x = jax.random.normal(k1, (bs, chs, seq_len), dtype=jnp.float32)
    ctrl = jax.random.uniform(k2, (bs, 1, 1), dtype=jnp.float32)   # normalized [0,1]
    y, pd = phase_shift(x, ctrl, sample_rate=44100.0)
    y = jax.block_until_ready(y)
    ref, shift_ref = _reference(x, ctrl)
    assert y.shape == x.shape and y.dtype == x.dtype
    assert jnp.allclose(y, ref, atol=1e-5, rtol=1e-5)
    assert jnp.allclose(pd["shift"], shift_ref, atol=1e-5, rtol=1e-5)

    # Case 2: multi-tile sequence path (exercises the precomputed boundary column).
    bs2, seq2 = 4, 1024
    x2 = jax.random.normal(k3, (bs2, 1, seq2), dtype=jnp.float32)
    ctrl2 = jax.random.uniform(k4, (bs2, 1, 1), dtype=jnp.float32)
    y2, _ = phase_shift(x2, ctrl2, seq_tile=256)
    y2 = jax.block_until_ready(y2)
    ref2, _ = _reference(x2, ctrl2)
    assert jnp.allclose(y2, ref2, atol=1e-5, rtol=1e-5)

    # Case 3: non-128-multiple sequence length (full-seq single block path).
    bs3, seq3 = 3, 300
    x3 = jax.random.normal(k1, (bs3, 1, seq3), dtype=jnp.float32)
    ctrl3 = jax.random.uniform(k2, (bs3, 1, 1), dtype=jnp.float32)
    y3, _ = phase_shift(x3, ctrl3)
    y3 = jax.block_until_ready(y3)
    ref3, _ = _reference(x3, ctrl3)
    assert jnp.allclose(y3, ref3, atol=1e-5, rtol=1e-5)

    # Case 4: batch > 8 (multiple batch blocks) + multi-tile seq, both axes parallel.
    bs4, seq4 = 12, 512
    x4 = jax.random.normal(k3, (bs4, 1, seq4), dtype=jnp.float32)
    ctrl4 = jax.random.uniform(k4, (bs4, 1, 1), dtype=jnp.float32)
    y4, _ = phase_shift(x4, ctrl4, seq_tile=256)
    y4 = jax.block_until_ready(y4)
    ref4, _ = _reference(x4, ctrl4)
    assert jnp.allclose(y4, ref4, atol=1e-5, rtol=1e-5)

    print("KERNEL_OK")
</pallas_src>

<mosaic_0001>
module attributes {stable_mosaic.version = 11 : i64} {
  func.func @_phase_shift_kernel(%arg0: i32, %arg1: i32, %arg2: memref<2x256xf32, #tpu.memory_space<vmem>>, %arg3: memref<1x2x3xf32, #tpu.memory_space<vmem>>, %arg4: memref<2x256xf32, #tpu.memory_space<vmem>>) attributes {dimension_semantics = [#tpu.dimension_semantics<parallel>, #tpu.dimension_semantics<parallel>], iteration_bounds = array<i64: 1, 1>, scalar_prefetch = 0 : i64, scratch_operands = 0 : i64, tpu.core_type = #tpu.core_type<tc>, window_params = [{transform_indices = @transform_0, window_bounds = array<i64: 2, 256>}, {transform_indices = @transform_1, window_bounds = array<i64: 1, 2, 3>}, {transform_indices = @transform_2, window_bounds = array<i64: 2, 256>}]} {
    %c0 = arith.constant 0 : index
    %c0_0 = arith.constant 0 : index
    %0 = vector.load %arg2[%c0, %c0_0] : memref<2x256xf32, #tpu.memory_space<vmem>>, vector<2x256xf32>
    %c0_1 = arith.constant 0 : index
    %c0_2 = arith.constant 0 : index
    %c0_3 = arith.constant 0 : index
    %1 = vector.load %arg3[%c0_1, %c0_2, %c0_3] : memref<1x2x3xf32, #tpu.memory_space<vmem>>, vector<1x2x3xf32>
    %2 = vector.shape_cast %1 : vector<1x2x3xf32> to vector<2x3xf32>
    %3 = vector.extract_strided_slice %2 {offsets = [0, 0], sizes = [2, 1], strides = [1, 1]} : vector<2x3xf32> to vector<2x1xf32>
    %4 = vector.extract_strided_slice %2 {offsets = [0, 1], sizes = [2, 1], strides = [1, 1]} : vector<2x3xf32> to vector<2x1xf32>
    %5 = vector.extract_strided_slice %2 {offsets = [0, 2], sizes = [2, 1], strides = [1, 1]} : vector<2x3xf32> to vector<2x1xf32>
    %c1_i32 = arith.constant 1 : i32
    %6 = tpu.dynamic_rotate %0 by %c1_i32 dim 1 : vector<2x256xf32>, i32 -> vector<2x256xf32>
    %7 = vector.broadcast %3 : vector<2x1xf32> to vector<2x256xf32>
    %8 = arith.mulf %0, %7 : vector<2x256xf32>
    %9 = vector.broadcast %4 : vector<2x1xf32> to vector<2x256xf32>
    %10 = arith.mulf %6, %9 : vector<2x256xf32>
    %11 = arith.addf %8, %10 : vector<2x256xf32>
    %c0_4 = arith.constant 0 : index
    %c0_5 = arith.constant 0 : index
    %12 = vector.load %arg4[%c0_4, %c0_5] : memref<2x256xf32, #tpu.memory_space<vmem>>, vector<2x256xf32>
    tpu.vector_store %arg4[%c0_4, %c0_5], %11 {strides = array<i32>} : memref<2x256xf32, #tpu.memory_space<vmem>>, vector<2x256xf32>,
    %13 = vector.extract_strided_slice %0 {offsets = [0, 0], sizes = [2, 1], strides = [1, 1]} : vector<2x256xf32> to vector<2x1xf32>
    %14 = arith.mulf %13, %3 : vector<2x1xf32>
    %15 = arith.addf %14, %5 : vector<2x1xf32>
    %c0_6 = arith.constant 0 : index
    %c0_7 = arith.constant 0 : index
    %16 = vector.load %arg4[%c0_6, %c0_7] : memref<2x256xf32, #tpu.memory_space<vmem>>, vector<2x1xf32>
    tpu.vector_store %arg4[%c0_6, %c0_7], %15 {strides = array<i32>} : memref<2x256xf32, #tpu.memory_space<vmem>>, vector<2x1xf32>,
    return
  }
  func.func @transform_0(%arg0: i32, %arg1: i32) -> (i32, i32) {
    %c0_i32 = arith.constant 0 : i32
    return %arg0, %arg1 : i32, i32
  }
  func.func @transform_1(%arg0: i32, %arg1: i32) -> (i32, i32, i32) {
    %c0_i32 = arith.constant 0 : i32
    %c0_i32_0 = arith.constant 0 : i32
    return %arg1, %arg0, %c0_i32 : i32, i32, i32
  }
  func.func @transform_2(%arg0: i32, %arg1: i32) -> (i32, i32) {
    %c0_i32 = arith.constant 0 : i32
    return %arg0, %arg1 : i32, i32
  }
}

</mosaic_0001>

<bundles_post_ra>
// kernel: tpu_custom_call.1
= control target key start
LH: loop header
LB: loop body
LE: loop exit
PB: predicated region body
PF: predicated region fallthrough
CT: control target
= control target key end

     0   :  { %7 = vsyncpa [#allocation3], 0  ;;  %s231_s0 = inlined_call_operand.hbm [shape: f32[2,256], index: 0, kind: input, shape index: {}]   ;;  %s232_s1 = inlined_call_operand.hbm [shape: f32[1,2,3], index: 1, kind: input, shape index: {}]   ;;  %s233_s2 = inlined_call_operand.hbm [shape: f32[2,256], index: 2, kind: output, shape index: {}]  }
   0x1   :  { %8 = vsyncpa [#allocation6], 0 }
   0x2   :  { %9 = vsyncpa [#allocation4], 0  ;;  %s198_s9 = smov [#allocation2]   ;;  %s199_s11 = smov [#allocation5]  }
   0x3   :  { %s16_s10 = sshll.u32 %s198_s9, 4  ;;  %s26_s12 = sshll.u32 %s199_s11, 4  ;;  %s17_s10 = int_to_ptr.vmem [resolvable:$true] %s16_s10  ;;  %s27_s12 = int_to_ptr.vmem [resolvable:$true] %s26_s12 }
   0x4   :  { %s140_s13 = scalar_lea.vmem %s17_s10, 64  ;;  %p145_p1 = scmp.lt.s32.totalorder %s17_s10, %s17_s10 }
   0x5   :  { %p141_p0 = scmp.ne.s32.totalorder %s17_s10, %s140_s13  ;;  %p146_p2 = scmp.lt.s32.totalorder %s140_s13, %s140_s13 }
   0x7   :  { %p147_p3 = por %p146_p2, %p145_p1 }
   0x9   :  { %p148_p4 = pnand %p147_p3, %p141_p0 }
   0xb   :  { %151 = shalt.err (!%p148_p4)
}
   0xc   :  { %19 = dma.hbm_to_vmem [thread:$0]  %s231_s0, 64, %s17_s10, [#allocation3]  }
   0xd   :  { %s160_s16 = scalar_lea.vmem %s27_s12, 32  ;;  %p165_p6 = scmp.lt.s32.totalorder %s27_s12, %s27_s12 }
   0xe   :  { %p161_p5 = scmp.ne.s32.totalorder %s27_s12, %s160_s16  ;;  %p166_p7 = scmp.lt.s32.totalorder %s160_s16, %s160_s16 }
  0x10   :  { %p167_p8 = por %p166_p7, %p165_p6 }
  0x12   :  { %p168_p9 = pnand %p167_p8, %p161_p5 }
  0x14   :  { %171 = shalt.err (!%p168_p9)
}
  0x15   :  { %29 = dma.hbm_to_vmem [thread:$0]  %s232_s1, 32, %s27_s12, [#allocation6]  }
  0x16   :  { %192 = dma.done.wait [#allocation3], 64  }
  0x17   :  { %193 = vsyncadd [#allocation3], 4294967232 }
  0x18   :  { %194 = dma.done.wait [#allocation6], 32  }
  0x19   :  { %195 = vsyncadd [#allocation6], 4294967264  ;;  %v42_v0 = vlaneseq  ;;  %v200_v1 = vmov 1   ;;  %v201_v2 = vmov 1983009808   ;;  %s202_s0 = smov 1  }
  0x1a   :  { %129 = vset.pattern.permute.xlu0 %v200_v1  ;;  %v40_v3 = vunpack.c.l.s4 %v201_v2  ;;  %v37_v7 = vld [vmem:[#allocation5] sm:$0x3]  ;;  %v36_v8 = vld [vmem:[#allocation2] sm:$0xf]  ;;  %v203_v11 = vmov 0   ;;  %s204_s1 = smov 126  }
  0x1b   :  { %v43_v4 = vshrl.u32 %v42_v0, 7  ;;  %72 = vperm.xlu0 %129, %v37_v7   ;;  %v54_v13 = vand.u32 127, %v42_v0  ;;  %v205_v15 = vmov 269488144   ;;  %v90_v27 = vmul.f32 %v37_v7, %v36_v8  ;;  %s206_s19 = smov [#allocation7]  }
  0x1c   :  { %v41_v5 = vunpack.c.0.s8 %v40_v3  ;;  %v63_v16 = vunpack.c.l.s4 %v205_v15  ;;  %s110_s20 = sshll.u32 %s206_s19, 4  ;;  %vm102_vm1 = vcmask 1024   ;;  %s111_s20 = int_to_ptr.vmem [resolvable:$true] %s110_s20 }
  0x1d   :  { %vm55_vm0 = vcmp.lt.s32.totalorder %v54_v13, 1  ;;  %s172_s21 = scalar_lea.vmem %s111_s20, 64  ;;  %p177_p11 = scmp.lt.s32.totalorder %s111_s20, %s111_s20 }
  0x1e   :  { %v44_v6 = vsub.s32 %v41_v5, %v43_v4  ;;  %v64_v20 = vunpack.c.0.s8 %v63_v16  ;;  %p173_p10 = scmp.ne.s32.totalorder %s111_s20, %s172_s21  ;;  %p178_p12 = scmp.lt.s32.totalorder %s172_s21, %s172_s21 }
  0x1f   :  { %130 = vset.pattern.permute.xlu0 %v203_v11 }
  0x20   :  { %v45_v9 = vrot.slane %v36_v8, %v44_v6  ;;  %60 = vperm.xlu0 %130, %v37_v7   ;;  %v97_v12 = vrot.slane %v37_v7, %v44_v6  ;;  %v67_v24 = vsub.s32 %v64_v20, %v43_v4  ;;  %p179_p13 = por %p178_p12, %p177_p11 }
  0x22   :  { %49 = vrot.lane.b32.xlu1 %v45_v9, %s202_s0  ;;  %v46_v10 = vcombine.high %v45_v9, %v45_v9  ;;  %p180_p0 = pnand %p179_p13, %p173_p10 }
  0x24   :  { %131 = vset.pattern.permute.xlu0 %v200_v1 }
  0x26   :  { %51 = vrot.lane.b32.xlu1 %v46_v10, %s202_s0 }
  0x2a   :  { %98 = vrot.lane.b32.xlu1 %v97_v12, %s204_s1 }
  0x94   :  { %v50_v14 = vpop.permute.xlu1 %49 }
  0x96   :  { %v73_v21 = vpop.permute.xlu0 %72 }
  0x98   :  { %v52_v17 = vpop.permute.xlu1 %51 }
  0x99   :  { %v56_v18 = vsel %vm55_vm0, %v50_v14, %v52_v17  ;;  %v57_v19 = vsel %vm55_vm0, %v52_v17, %v50_v14 }
  0x9a   :  { %v75_v22 = vmul.f32 %v73_v21, %v57_v19  ;;  %v76_v23 = vmul.f32 %v73_v21, %v56_v18 }
  0x9b   :  { %v61_v26 = vpop.permute.xlu0 %60 }
  0x9c   :  { %v79_v25 = vcombine.low %v75_v22, %v76_v23  ;;  %v68_v28 = vrot.slane %v61_v26, %v67_v24  ;;  %v99_v29 = vpop.permute.xlu1 %98 }
  0x9d   :  { %v101_v32 = vadd.f32 %v99_v29, %v90_v27 }
  0x9e   :  { %v86_v30 = vrot.slane %v79_v25, %v44_v6  ;;  %v70_v31 = vmul.f32 %v68_v28, %v36_v8 }
  0xa0   :  { %v88_v33 = vadd.f32 %v86_v30, %v70_v31 }
  0xa2   :  { %89 = vst [vmem:[#allocation7] sm:$0xf] %v88_v33 }
  0xa3   :  { %103 = vst.msk [vmem:[#allocation7] sm:$0x3] %vm102_vm1, %v101_v32 }
  0xa4   :  { %183 = shalt.err (!%p180_p0)
}
  0xa5   :  { %113 = dma.vmem_to_hbm [thread:$0]  %s111_s20, 64, %s233_s2, [#allocation4]  }
  0xa6   :  { %196 = dma.done.wait [#allocation4], 64  }
  0xa7   :  { %197 = vsyncadd [#allocation4], 4294967232 }
  0xa8   :  { %117 = vsyncpa [#allocation3], 1 }
  0xa9   :  { %118 = vsyncpa [#allocation6], 1 }
  0xaa   :  { %119 = vsyncpa [#allocation4], 1 }

</bundles_post_ra>
